<compile_context>
chip_gen: v7x
topology: tpu7x:2x2x1
jax: 0.10.0
libtpu: 0.0.40
codegen_flags: <defaults>
</compile_context>

<pallas_src>
import jax
import jax.numpy as jnp
from jax.experimental import pallas as pl
from jax.experimental.pallas import tpu as pltpu

K = 4          # ConvTranspose2d kernel size
STRIDE = 2
PAD = 1
BN_EPS = 1e-5  # nn.BatchNorm2d default eps


def conv_stats_kernel(patch_ref, w_ref, y_ref, s_ref, ss_ref):
    """Fused 4-phase transposed-conv tile + BatchNorm partial statistics.

    patch_ref : (1, KD_P, TM)    bf16  lane-dense 3x3-halo im2col patches
    w_ref     : (4*Cout, KD_P)   bf16  phase-major im2col weights
    y_ref     : (1, 4*Cout, TM)  bf16  conv output, rows = phase*Cout + co
    s_ref     : (1, 1, 4*Cout, 1) f32  per-block sum   (BN partial)
    ss_ref    : (1, 1, 4*Cout, 1) f32  per-block sumsq (BN partial)
    """
    acc = jnp.dot(w_ref[...], patch_ref[0],
                  preferred_element_type=jnp.float32)        # (4*Cout, TM) f32
    y_ref[0] = acc.astype(y_ref.dtype)
    # BN partials from the f32 accumulator (before the bf16 cast).
    s_ref[0, 0] = jnp.sum(acc, axis=-1, keepdims=True)
    ss_ref[0, 0] = jnp.sum(acc * acc, axis=-1, keepdims=True)


def _pick_spatial_tile(hw: int, kdim: int) -> int:
    """Lane tile for pass 1: a multiple of 256 (fills the 2x256 MXU on
    v6e/v7x) that divides H*W and keeps the bf16 patch block <= ~4 MiB so
    double-buffered in+out blocks stay well inside v7x's 64 MiB VMEM."""
    if hw % 256 != 0:
        return hw                                  # full-extent block: always legal
    budget = max(256, ((4 << 20) // (2 * kdim)) // 256 * 256)
    tm = min(hw, budget, 2048)
    while hw % tm:
        tm -= 256
    return tm


@jax.jit
def upsample_forward(x_nchw, w_ct, gamma, beta):
    """UpSample.forward.  x_nchw: (N, Cin, H, W), w_ct: (Cin, Cout, K, K)."""
    N, Cin, H, W = x_nchw.shape
    Cin_w, Cout, Kh, Kw = w_ct.shape
    assert Cin == Cin_w and Kh == K and Kw == K
    Ho, Wo = STRIDE * H, STRIDE * W
    HW = H * W
    KD = 9 * Cin                           # 3x3-halo im2col contraction size
    KD_P = ((KD + 15) // 16) * 16          # pad K to bf16 sublane packing
    CP = 4 * Cout                          # phase-major output rows

    # ---- wrapper-side im2col (plain JAX, fused by XLA; no transposes) -------
    # Derivation (stride=2, pad=1, k=4), xp = x zero-padded by 1 spatially:
    #   out[n, co, 2r+p, 2c+q] =
    #     sum_{dh3,dw3,ci} xp[n, ci, r+dh3, c+dw3] * w[ci, co, 3+p-2*dh3, 3+q-2*dw3]
    # taps whose kernel index falls outside [0,3] contribute zero weights.
    xp = jnp.pad(x_nchw.astype(jnp.bfloat16),
                 ((0, 0), (0, 0), (1, 1), (1, 1)))             # (N, Cin, H+2, W+2)
    taps = [xp[:, :, dh:dh + H, dw:dw + W]
            for dh in range(3) for dw in range(3)]             # 9 x (N, Cin, H, W)
    patch = jnp.stack(taps, axis=1).reshape(N, KD, HW)         # (N, 9*Cin, H*W)
    if KD_P != KD:
        patch = jnp.pad(patch, ((0, 0), (0, KD_P - KD), (0, 0)))
    # TODO(synk): for production-size Cin, slice the halo taps inside the kernel
    # (H-tiled, halo'd index map) instead of materializing the 9x patch in HBM.

    # ---- phase-major im2col weights: (4*Cout, 9*Cin), col = tap*Cin + ci -----
    w32 = w_ct.astype(jnp.float32)
    zero_blk = jnp.zeros((Cout, Cin), jnp.float32)
    phase_rows = []
    for p in range(2):
        for q in range(2):
            blks = []
            for dh3 in range(3):
                for dw3 in range(3):
                    kh, kw = 3 + p - 2 * dh3, 3 + q - 2 * dw3
                    blks.append(w32[:, :, kh, kw].T
                                if 0 <= kh <= 3 and 0 <= kw <= 3 else zero_blk)
            phase_rows.append(jnp.concatenate(blks, axis=1))   # (Cout, 9*Cin)
    w_all = jnp.concatenate(phase_rows, axis=0)                # (4*Cout, 9*Cin)
    if KD_P != KD:
        w_all = jnp.pad(w_all, ((0, 0), (0, KD_P - KD)))
    w_all = w_all.astype(jnp.bfloat16)

    # ---- pass 1: conv (all phases, one dot per block) + BN partials ----------
    TM = _pick_spatial_tile(HW, KD_P)
    n_m = HW // TM
    y, s_part, ss_part = pl.pallas_call(
        conv_stats_kernel,
        out_shape=(jax.ShapeDtypeStruct((N, CP, HW), jnp.bfloat16),
                   jax.ShapeDtypeStruct((N, n_m, CP, 1), jnp.float32),
                   jax.ShapeDtypeStruct((N, n_m, CP, 1), jnp.float32)),
        grid=(N, n_m),
        in_specs=[
            pl.BlockSpec((1, KD_P, TM), lambda n, m: (n, 0, m)),
            pl.BlockSpec((CP, KD_P), lambda n, m: (0, 0)),
        ],
        out_specs=(
            pl.BlockSpec((1, CP, TM), lambda n, m: (n, 0, m)),
            pl.BlockSpec((1, 1, CP, 1), lambda n, m: (n, m, 0, 0)),
            pl.BlockSpec((1, 1, CP, 1), lambda n, m: (n, m, 0, 0)),
        ),
        compiler_params=pltpu.CompilerParams(
            dimension_semantics=("parallel", "parallel"),
            vmem_limit_bytes=32 * 1024 * 1024),
    )(patch, w_all)

    # ---- tiny glue: batch stats -> fused per-channel scale / shift (f32) -----
    cnt = N * Ho * Wo
    s = jnp.sum(s_part[..., 0], axis=(0, 1)).reshape(4, Cout).sum(axis=0)
    ss = jnp.sum(ss_part[..., 0], axis=(0, 1)).reshape(4, Cout).sum(axis=0)
    mean = s / cnt
    var = jnp.maximum(ss / cnt - mean * mean, 0.0)
    # TODO(synk): for production-scale per-channel counts use a shifted/Welford
    # combination of the per-block partials (E[x^2]-mean^2 can cancel badly).
    scale = gamma.astype(jnp.float32) * jax.lax.rsqrt(var + BN_EPS)
    shift = beta.astype(jnp.float32) - mean * scale

    # ---- fused BN + ReLU + phase reassembly (single XLA fusion, 2 HBM passes)
    yb = y.reshape(N, 2, 2, Cout, H, W).astype(jnp.float32)     # (n, p, q, co, r, c)
    yb = jnp.maximum(yb * scale.reshape(1, 1, 1, Cout, 1, 1)
                     + shift.reshape(1, 1, 1, Cout, 1, 1), 0.0)
    out = jnp.transpose(yb, (0, 3, 4, 1, 5, 2))                 # (n, co, r, p, c, q)
    return out.reshape(N, Cout, Ho, Wo)
    # TODO(synk): nn.Dropout branch omitted (module default dropout=False);
    # BatchNorm running_mean/var buffer updates are training-side state only.


def reference_forward(x_nchw, w_ct, gamma, beta):
    """Pure-JAX reference (lhs-dilated conv == ConvTranspose2d(s=2, p=1))."""
    w_oihw = jnp.transpose(jnp.flip(w_ct, axis=(2, 3)), (1, 0, 2, 3))
    y = jax.lax.conv_general_dilated(
        x_nchw, w_oihw, window_strides=(1, 1),
        padding=[(K - 1 - PAD, K - 1 - PAD)] * 2,
        lhs_dilation=(STRIDE, STRIDE),
        dimension_numbers=("NCHW", "OIHW", "NCHW"),
        precision=jax.lax.Precision.HIGHEST)
    mean = jnp.mean(y, axis=(0, 2, 3), keepdims=True)
    var = jnp.mean((y - mean) ** 2, axis=(0, 2, 3), keepdims=True)
    yn = (y - mean) * jax.lax.rsqrt(var + BN_EPS)
    yn = yn * gamma.reshape(1, -1, 1, 1) + beta.reshape(1, -1, 1, 1)
    return jnp.maximum(yn, 0.0)


if __name__ == "__main__":
    key = jax.random.PRNGKey(0)
    k1, k2, k3, k4 = jax.random.split(key, 4)

    N, Cin, Cout, H, W = 2, 4, 8, 16, 16
    x = jax.random.normal(k1, (N, Cin, H, W), jnp.float32)
    # nn.ConvTranspose2d weight layout: (in_channels, out_channels, kH, kW)
    w = jax.random.normal(k2, (Cin, Cout, K, K), jnp.float32) * 0.1
    gamma = 1.0 + 0.1 * jax.random.normal(k3, (Cout,), jnp.float32)
    beta = 0.1 * jax.random.normal(k4, (Cout,), jnp.float32)

    out = jax.block_until_ready(upsample_forward(x, w, gamma, beta))
    assert out.shape == (N, Cout, 2 * H, 2 * W), out.shape

    # Structural check: reference fed the same bf16-rounded inputs (isolates the
    # phase/im2col/BN math; tolerance covers the intentional bf16 intermediate).
    x_r = x.astype(jnp.bfloat16).astype(jnp.float32)
    w_r = w.astype(jnp.bfloat16).astype(jnp.float32)
    ref_b = reference_forward(x_r, w_r, gamma, beta)
    assert jnp.allclose(out, ref_b, atol=1e-2, rtol=1e-2), float(
        jnp.max(jnp.abs(out - ref_b)))

    # Loose check vs full-f32 reference (bf16 MXU inputs / y are intentional).
    ref_f = reference_forward(x, w, gamma, beta)
    assert jnp.allclose(out, ref_f, atol=5e-2, rtol=5e-2), float(
        jnp.max(jnp.abs(out - ref_f)))

    print("KERNEL_OK")
</pallas_src>

<mosaic_0001>
module attributes {stable_mosaic.version = 11 : i64} {
  func.func @conv_stats_kernel(%arg0: i32, %arg1: i32, %arg2: memref<1x48x256xbf16, #tpu.memory_space<vmem>>, %arg3: memref<32x48xbf16, #tpu.memory_space<vmem>>, %arg4: memref<1x32x256xbf16, #tpu.memory_space<vmem>>, %arg5: memref<1x1x32x1xf32, #tpu.memory_space<vmem>>, %arg6: memref<1x1x32x1xf32, #tpu.memory_space<vmem>>) attributes {dimension_semantics = [#tpu.dimension_semantics<parallel>, #tpu.dimension_semantics<parallel>], iteration_bounds = array<i64: 2, 1>, scalar_prefetch = 0 : i64, scratch_operands = 0 : i64, tpu.core_type = #tpu.core_type<tc>, window_params = [{transform_indices = @transform_0, window_bounds = array<i64: 1, 48, 256>}, {pipeline_mode = #tpu.pipeline_mode<synchronous>, transform_indices = @transform_1, window_bounds = array<i64: 32, 48>}, {transform_indices = @transform_2, window_bounds = array<i64: 1, 32, 256>}, {transform_indices = @transform_3, window_bounds = array<i64: 1, 1, 32, 1>}, {transform_indices = @transform_4, window_bounds = array<i64: 1, 1, 32, 1>}]} {
    %c0 = arith.constant 0 : index
    %c0_0 = arith.constant 0 : index
    %0 = vector.load %arg3[%c0, %c0_0] : memref<32x48xbf16, #tpu.memory_space<vmem>>, vector<32x48xbf16>
    %c0_1 = arith.constant 0 : index
    %c0_2 = arith.constant 0 : index
    %c0_3 = arith.constant 0 : index
    %1 = vector.load %arg2[%c0_1, %c0_2, %c0_3] : memref<1x48x256xbf16, #tpu.memory_space<vmem>>, vector<1x48x256xbf16>
    %2 = vector.shape_cast %1 : vector<1x48x256xbf16> to vector<48x256xbf16>
    %cst = arith.constant dense<0.000000e+00> : vector<32x256xf32>
    %3 = tpu.matmul %0, %2, %cst {dimension_numbers = #tpu.dot_dimension_numbers<[1], [0], [0], [1], [0, 0, 1, 1], [], []>} : vector<32x48xbf16>, vector<48x256xbf16>, vector<32x256xf32> -> vector<32x256xf32>
    %4 = arith.truncf %3 : vector<32x256xf32> to vector<32x256xbf16>
    %c0_4 = arith.constant 0 : index
    %c0_5 = arith.constant 0 : index
    %c0_6 = arith.constant 0 : index
    %5 = vector.load %arg4[%c0_4, %c0_5, %c0_6] : memref<1x32x256xbf16, #tpu.memory_space<vmem>>, vector<1x32x256xbf16>
    %6 = vector.shape_cast %5 : vector<1x32x256xbf16> to vector<32x256xbf16>
    %7 = vector.shape_cast %4 : vector<32x256xbf16> to vector<1x32x256xbf16>
    tpu.vector_store %arg4[%c0_4, %c0_5, %c0_6], %7 {strides = array<i32>} : memref<1x32x256xbf16, #tpu.memory_space<vmem>>, vector<1x32x256xbf16>,
    %cst_7 = arith.constant dense<0.000000e+00> : vector<32xf32>
    %8 = vector.multi_reduction <add>, %3, %cst_7 [1] : vector<32x256xf32> to vector<32xf32>
    %9 = vector.shape_cast %8 : vector<32xf32> to vector<32x1xf32>
    %c0_8 = arith.constant 0 : index
    %c0_9 = arith.constant 0 : index
    %c0_10 = arith.constant 0 : index
    %c0_11 = arith.constant 0 : index
    %10 = vector.load %arg5[%c0_8, %c0_9, %c0_10, %c0_11] : memref<1x1x32x1xf32, #tpu.memory_space<vmem>>, vector<1x1x32x1xf32>
    %11 = vector.shape_cast %10 : vector<1x1x32x1xf32> to vector<32x1xf32>
    %12 = vector.shape_cast %9 : vector<32x1xf32> to vector<1x1x32x1xf32>
    tpu.vector_store %arg5[%c0_8, %c0_9, %c0_10, %c0_11], %12 {strides = array<i32>} : memref<1x1x32x1xf32, #tpu.memory_space<vmem>>, vector<1x1x32x1xf32>,
    %13 = arith.mulf %3, %3 : vector<32x256xf32>
    %cst_12 = arith.constant dense<0.000000e+00> : vector<32xf32>
    %14 = vector.multi_reduction <add>, %13, %cst_12 [1] : vector<32x256xf32> to vector<32xf32>
    %15 = vector.shape_cast %14 : vector<32xf32> to vector<32x1xf32>
    %c0_13 = arith.constant 0 : index
    %c0_14 = arith.constant 0 : index
    %c0_15 = arith.constant 0 : index
    %c0_16 = arith.constant 0 : index
    %16 = vector.load %arg6[%c0_13, %c0_14, %c0_15, %c0_16] : memref<1x1x32x1xf32, #tpu.memory_space<vmem>>, vector<1x1x32x1xf32>
    %17 = vector.shape_cast %16 : vector<1x1x32x1xf32> to vector<32x1xf32>
    %18 = vector.shape_cast %15 : vector<32x1xf32> to vector<1x1x32x1xf32>
    tpu.vector_store %arg6[%c0_13, %c0_14, %c0_15, %c0_16], %18 {strides = array<i32>} : memref<1x1x32x1xf32, #tpu.memory_space<vmem>>, vector<1x1x32x1xf32>,
    return
  }
  func.func @transform_0(%arg0: i32, %arg1: i32) -> (i32, i32, i32) {
    %c0_i32 = arith.constant 0 : i32
    %c0_i32_0 = arith.constant 0 : i32
    return %arg0, %c0_i32, %arg1 : i32, i32, i32
  }
  func.func @transform_1(%arg0: i32, %arg1: i32) -> (i32, i32) {
    %c0_i32 = arith.constant 0 : i32
    %c0_i32_0 = arith.constant 0 : i32
    %c0_i32_1 = arith.constant 0 : i32
    return %c0_i32, %c0_i32_0 : i32, i32
  }
  func.func @transform_2(%arg0: i32, %arg1: i32) -> (i32, i32, i32) {
    %c0_i32 = arith.constant 0 : i32
    %c0_i32_0 = arith.constant 0 : i32
    return %arg0, %c0_i32, %arg1 : i32, i32, i32
  }
  func.func @transform_3(%arg0: i32, %arg1: i32) -> (i32, i32, i32, i32) {
    %c0_i32 = arith.constant 0 : i32
    %c0_i32_0 = arith.constant 0 : i32
    %c0_i32_1 = arith.constant 0 : i32
    return %arg0, %arg1, %c0_i32, %c0_i32_0 : i32, i32, i32, i32
  }
  func.func @transform_4(%arg0: i32, %arg1: i32) -> (i32, i32, i32, i32) {
    %c0_i32 = arith.constant 0 : i32
    %c0_i32_0 = arith.constant 0 : i32
    %c0_i32_1 = arith.constant 0 : i32
    return %arg0, %arg1, %c0_i32, %c0_i32_0 : i32, i32, i32, i32
  }
}

</mosaic_0001>

<bundles_post_ra>
// kernel: upsample_forward.1
= control target key start
LH: loop header
LB: loop body
LE: loop exit
PB: predicated region body
PF: predicated region fallthrough
CT: control target
= control target key end

     0   :  { %s783_s15 = smov 0   ;;  %s785_s16 = smov 0   ;;  %s841_s0 = inlined_call_operand.vmem [shape: bf16[2,48,256], index: 0, kind: input, shape index: {}]   ;;  %s842_s1 = inlined_call_operand.vmem [shape: bf16[32,48], index: 1, kind: input, shape index: {}]   ;;  %s843_s2 = inlined_call_operand.vmem [shape: bf16[2,32,256], index: 2, kind: output, shape index: {0}]   ;;  %s844_s3 = inlined_call_operand.vmem [shape: f32[2,1,32,1], index: 3, kind: output, shape index: {1}]   ;;  %s845_s4 = inlined_call_operand.vmem [shape: f32[2,1,32,1], index: 4, kind: output, shape index: {2}]  }
   0x1   :  { %s787_s17 = smov 0  }
   0x2 LB: > { %s27_s18 = sadd.s32 1, %s751_s16  ;;  %p659_p0 = scmp.ge.s32.totalorder %s755_s17, 1  ;;  %s755_s17 = sphi %s787_s17, %s15_s17   ;;  %s751_s16 = sphi %s785_s16, %s847_s16   ;;  %s747_s15 = sphi %s783_s15, %s846_s15  }
   0x3   : > { %p29_p1 = scmp.ge.s32.totalorder %s27_s18, 2  ;;  %p192_p2 = scmp.lt.s32.totalorder %s755_s17, 3 }
   0x5   : > { %s849_s18 = smov (%p29_p1, %s27_s18), 0  ;;  %p193_p3 = pnand %p659_p0, %p192_p2 }
   0x6   : > { %p245_p4 = scmp.lt.s32.totalorder (!%p193_p3), %s747_s15, 1  ;;  %v757_v0 = vmov (!%p193_p3), 0   ;;  %v731_v7 = vld [vmem:[%s842_s1] sm:$0xff] (!%p193_p3)   ;;  %v732_v8 = vld [vmem:[%s842_s1 + $0x8] sm:$0xff] (!%p193_p3)   ;;  %vm333_vm0 = vcmask (!%p193_p3), 392192   ;;  %vm433_vm1 = vcmask (!%p193_p3), 7168  }
   0x7   : > { %196 = sbr.rel (%p193_p3) target bundleno = 402 (0x192), region = 28  ;;  %372 = vmatprep.mubr.bf16.mxu0 (!%p193_p3), %v757_v0  ;;  %382 = vmatprep.mubr.bf16.mxu1 (!%p193_p3), %v757_v0 }
   0xe   : > { %s851_s15 = smov (!%p245_p4, %s747_s15), 1 }
   0xf   : > { %s696_s19 = smul.u32 48, %s851_s15  ;;  %s810_s27 = sshll.u32 %s851_s15, 5 }
  0x10   : > { %s262_s30 = scalar_lea.vmem %s843_s2, %s810_s27  ;;  %s272_s7 = scalar_lea.vmem %s844_s3, %s810_s27 }
  0x11   : > { %s252_s22 = scalar_lea.vmem %s841_s0, %s696_s19  ;;  %s281_s10 = scalar_lea.vmem %s845_s4, %s810_s27 }
  0x12   : > { %v722_v1 = vld [vmem:[%s252_s22 + $0x4] ss:$8 sps:$4 sm:$0xff]   ;;  %v724_v2 = vld [vmem:[%s252_s22] ss:$8 sps:$4 sm:$0xff]   ;;  %v725_v3 = vld [vmem:[%s252_s22 + $0x14] ss:$8 sps:$4 sm:$0xff]  }
  0x13   : > { %340 = vmatprep.subr.bf16.mxu0 %v722_v1  ;;  %690 = vmatprep.subr.bf16.mxu1 %v722_v1  ;;  %v727_v4 = vld [vmem:[%s252_s22 + $0x10] ss:$8 sps:$4 sm:$0xff]   ;;  %v728_v5 = vld [vmem:[%s252_s22 + $0x24] ss:$8 sps:$4 sm:$0xff]   ;;  %v730_v6 = vld [vmem:[%s252_s22 + $0x20] ss:$8 sps:$4 sm:$0xff]  }
  0x14   : > { %341 = vmatpush1.bf16.msra.mxu0 %v724_v2  ;;  %693 = vmatpush1.bf16.msra.mxu1 %v724_v2 }
  0x15   : > { %342 = vmatprep.subr.bf16.mxu0 %v725_v3  ;;  %691 = vmatprep.subr.bf16.mxu1 %v725_v3 }
  0x18   : > { %343 = vmatpush1.bf16.msra.mxu0 %v727_v4  ;;  %694 = vmatpush1.bf16.msra.mxu1 %v727_v4 }
  0x19   : > { %344 = vmatprep.subr.bf16.mxu0 %v728_v5  ;;  %692 = vmatprep.subr.bf16.mxu1 %v728_v5 }
  0x1c   : > { %345 = vmatpush1.bf16.msra.mxu0 %v730_v6  ;;  %695 = vmatpush1.bf16.msra.mxu1 %v730_v6 }
  0x1f   : > { %675 = vmatmul.mubr.msk.bf16.vlgmr.msra.gmra.mrb[0].mxu0 %vm333_vm0, %v731_v7  ;;  %676 = vmatmul.mubr.msk.bf16.vlgmr.msra.gmra.mrb[0].mxu1 %vm333_vm0, %v732_v8 }
  0xf2   : > { %v374_v9 = vpop.f32.mrb[0].mxu0  ;;  %v384_v10 = vpop.f32.mrb[0].mxu1 }
  0xf3   : > { %v376_v11 = vpop.f32.mrb[1].mxu0  ;;  %v386_v12 = vpop.f32.mrb[1].mxu1  ;;  %v438_v13 = vmul.f32 %v374_v9, %v374_v9  ;;  %v442_v14 = vmul.f32 %v384_v10, %v384_v10 }
  0xf4   : > { %v686_v15 = vpack.c.bf16 %v376_v11, %v374_v9  ;;  %v688_v16 = vpack.c.bf16 %v386_v12, %v384_v10  ;;  %v378_v17 = vpop.f32.mrb[2].mxu0  ;;  %v388_v18 = vpop.f32.mrb[2].mxu1  ;;  %v427_v19 = vadd.f32 %v386_v12, %v384_v10  ;;  %v421_v20 = vadd.f32 %v376_v11, %v374_v9 }
  0xf5   : > { %v380_v21 = vpop.f32.mrb[3].mxu0  ;;  %v390_v22 = vpop.f32.mrb[3].mxu1  ;;  %v440_v23 = vmul.f32 %v378_v17, %v378_v17  ;;  %v439_v24 = vmul.f32 %v376_v11, %v376_v11  ;;  %v444_v25 = vmul.f32 %v388_v18, %v388_v18  ;;  %v443_v26 = vmul.f32 %v386_v12, %v386_v12 }
  0xf6   : > { %417 = vst [vmem:[%s262_s30] sm:$0xff] %v686_v15  ;;  %419 = vst [vmem:[%s262_s30 + $0x10] sm:$0xff] %v688_v16  ;;  %v687_v27 = vpack.c.bf16 %v380_v21, %v378_v17  ;;  %v441_v28 = vmul.f32 %v380_v21, %v380_v21  ;;  %v689_v29 = vpack.c.bf16 %v390_v22, %v388_v18  ;;  %428 = vadd.xlane.f32.xlu1 %v427_v19 }
  0xf7   : > { %v445_v30 = vmul.f32 %v390_v22, %v390_v22  ;;  %422 = vadd.xlane.f32.xlu0 %v421_v20  ;;  %v430_v31 = vadd.f32 %v390_v22, %v388_v18  ;;  %v424_v32 = vadd.f32 %v380_v21, %v378_v17  ;;  %v446_v33 = vadd.f32 %v439_v24, %v438_v13 }
  0xf8   : > { %v452_v34 = vadd.f32 %v443_v26, %v442_v14  ;;  %418 = vst [vmem:[%s262_s30 + $0x8] sm:$0xff] %v687_v27  ;;  %420 = vst [vmem:[%s262_s30 + $0x18] sm:$0xff] %v689_v29  ;;  %v449_v35 = vadd.f32 %v441_v28, %v440_v23 }
  0xf9   : > { %v455_v36 = vadd.f32 %v445_v30, %v444_v25 }
  0xfa   : > { %431 = vadd.xlane.f32.xlu1 %v430_v31 }
  0xfb   : > { %425 = vadd.xlane.f32.xlu0 %v424_v32 }
  0xfe   : > { %450 = vadd.xlane.f32.xlu1 %v449_v35 }
  0xff   : > { %447 = vadd.xlane.f32.xlu0 %v446_v33 }
 0x102   : > { %456 = vadd.xlane.f32.xlu1 %v455_v36 }
 0x103   : > { %453 = vadd.xlane.f32.xlu0 %v452_v34 }
 0x183   : > { %v429_v37 = vpop.xlane.xlu1 %428 }
 0x184   : > { %436 = vst.msk [vmem:[%s272_s7 + $0x10] sm:$0xff] %vm433_vm1, %v429_v37  ;;  %v423_v38 = vpop.xlane.xlu0 %422 }
 0x185   : > { %434 = vst.msk [vmem:[%s272_s7] sm:$0xff] %vm433_vm1, %v423_v38 }
 0x187   : > { %v432_v39 = vpop.xlane.xlu1 %431 }
 0x188   : > { %437 = vst.msk [vmem:[%s272_s7 + $0x18] sm:$0xff] %vm433_vm1, %v432_v39  ;;  %v426_v40 = vpop.xlane.xlu0 %425 }
 0x189   : > { %435 = vst.msk [vmem:[%s272_s7 + $0x8] sm:$0xff] %vm433_vm1, %v426_v40 }
 0x18b   : > { %v451_v41 = vpop.xlane.xlu1 %450 }
 0x18c   : > { %459 = vst.msk [vmem:[%s281_s10 + $0x8] sm:$0xff] %vm433_vm1, %v451_v41  ;;  %v448_v42 = vpop.xlane.xlu0 %447 }
 0x18d   : > { %458 = vst.msk [vmem:[%s281_s10] sm:$0xff] %vm433_vm1, %v448_v42 }
 0x18f   : > { %v457_v43 = vpop.xlane.xlu1 %456 }
 0x190   : > { %461 = vst.msk [vmem:[%s281_s10 + $0x18] sm:$0xff] %vm433_vm1, %v457_v43  ;;  %v454_v44 = vpop.xlane.xlu0 %453 }
 0x191   : > { %460 = vst.msk [vmem:[%s281_s10 + $0x10] sm:$0xff] %vm433_vm1, %v454_v44 }
 0x192 PF: > { %s15_s17 = sadd.s32 1, %s755_s17   ;;  %s846_s15 = smov %s751_s16 }
 0x193   : > { %p12_p5 = scmp.ge.s32.totalorder %s15_s17, 4   ;;  %s847_s16 = smov %s849_s18 }
 0x195   :  { %14 = sbr.rel (!%p12_p5) target bundleno = 2 (0x2), region = 82 }

</bundles_post_ra>
